<compile_context>
chip_gen: v6e
topology: v6e:2x2x1
jax: 0.10.0
libtpu: 0.0.40
codegen_flags: <defaults>
</compile_context>

<pallas_src>
import jax
import jax.numpy as jnp
from jax.experimental import pallas as pl
from jax.experimental.pallas import tpu as pltpu

_LANES = 128
_SUBLANES = 8


def _make_dice_kernel(rows, tile_rows):
    """Builds the per-(sample, row-tile) kernel with static tiling baked in."""
    fold = (tile_rows % _SUBLANES) == 0
    need_mask = (rows % tile_rows) != 0

    def kernel(x_ref, y_ref, inter_ref, sum_ref):
        r = pl.program_id(1)

        # Output blocks double as per-sample accumulators (resident across r).
        @pl.when(r == 0)
        def _init():
            inter_ref[...] = jnp.zeros_like(inter_ref)
            sum_ref[...] = jnp.zeros_like(sum_ref)

        x = x_ref[...].astype(jnp.float32)
        # Exact sigmoid via a single tanh EUP op (no exp + full divide).
        x = 0.5 * jnp.tanh(0.5 * x) + 0.5
        y = y_ref[...].astype(jnp.float32)

        if need_mask:
            # Ragged last row-tile: zero out rows past the end of the sample.
            valid = rows - r * tile_rows
            row_idx = jax.lax.broadcasted_iota(jnp.int32, (tile_rows, _LANES), 0)
            live = row_idx < valid
            x = jnp.where(live, x, 0.0)
            y = jnp.where(live, y, 0.0)

        inter = x * y
        both = x + y                      # fused x_sum + y_sum
        if fold and tile_rows > _SUBLANES:
            # Vreg-aligned fold of the tile to one (8, 128) vreg: pure VPU adds.
            inter = inter.reshape(tile_rows // _SUBLANES, _SUBLANES, _LANES).sum(axis=0)
            both = both.reshape(tile_rows // _SUBLANES, _SUBLANES, _LANES).sum(axis=0)

        inter_ref[...] += inter
        sum_ref[...] += both

    acc_rows = _SUBLANES if fold else tile_rows
    return kernel, acc_rows


def dice_loss(x, y, *, target_tile_bytes=6 * 1024 * 1024):
    """x: logits, y: targets; same shape (N, ...). Returns scalar f32 dice mean."""
    assert x.shape == y.shape
    n = x.shape[0]
    x_flat = x.reshape(n, -1)
    y_flat = y.reshape(n, -1)
    f = x_flat.shape[1]

    rows = (f + _LANES - 1) // _LANES
    f_pad = rows * _LANES
    if f_pad != f:
        # Minimal pad (< 128 elems/sample), only when F is not lane-aligned.
        # Logit pad -1e9 -> sigmoid exactly 0; target pad 0 -> contributes 0.
        pad = f_pad - f
        x_flat = jnp.pad(x_flat, ((0, 0), (0, pad)), constant_values=-1e9)
        y_flat = jnp.pad(y_flat, ((0, 0), (0, pad)), constant_values=0)

    itemsize = jnp.dtype(x_flat.dtype).itemsize
    budget_rows = max(
        _SUBLANES,
        (target_tile_bytes // (_LANES * itemsize)) // _SUBLANES * _SUBLANES,
    )
    if rows < _SUBLANES:
        tile_rows = rows                               # tiny sample: block == full dim
    else:
        tile_rows = int(min(budget_rows, (rows // _SUBLANES) * _SUBLANES))
    grid_r = (rows + tile_rows - 1) // tile_rows

    kernel, acc_rows = _make_dice_kernel(rows, tile_rows)

    x3 = x_flat.reshape(n, rows, _LANES)
    y3 = y_flat.reshape(n, rows, _LANES)

    # 2 inputs x 2 pipeline buffers x tile + tiny (8,128) output accumulators.
    tile_bytes = tile_rows * _LANES * itemsize
    vmem_limit = int(min(max(4 * tile_bytes + (8 << 20), 32 << 20), 56 << 20))

    inter_p, sum_p = pl.pallas_call(
        kernel,
        out_shape=(
            jax.ShapeDtypeStruct((n, acc_rows, _LANES), jnp.float32),
            jax.ShapeDtypeStruct((n, acc_rows, _LANES), jnp.float32),
        ),
        grid_spec=pltpu.PrefetchScalarGridSpec(
            num_scalar_prefetch=0,
            grid=(n, grid_r),
            in_specs=[
                pl.BlockSpec((None, tile_rows, _LANES), lambda i, r: (i, r, 0)),
                pl.BlockSpec((None, tile_rows, _LANES), lambda i, r: (i, r, 0)),
            ],
            out_specs=[
                pl.BlockSpec((None, acc_rows, _LANES), lambda i, r: (i, 0, 0)),
                pl.BlockSpec((None, acc_rows, _LANES), lambda i, r: (i, 0, 0)),
            ],
        ),
        compiler_params=pltpu.CompilerParams(
            dimension_semantics=("parallel", "arbitrary"),
            vmem_limit_bytes=vmem_limit,
        ),
    )(x3, y3)

    # Tiny per-sample finalize in the wrapper (dice + batch mean).
    smooth = jnp.float32(1.0)
    inter = jnp.sum(inter_p, axis=(1, 2))
    both = jnp.sum(sum_p, axis=(1, 2))
    dice = 2.0 * (inter + smooth) / (both + smooth)
    return jnp.sum(dice) / jnp.float32(n)


def _dice_loss_ref(x, y):
    # Pure-JAX reference mirroring the PyTorch module, for sanity checking.
    n = x.shape[0]
    xf = jax.nn.sigmoid(x.astype(jnp.float32)).reshape(n, -1)
    yf = y.astype(jnp.float32).reshape(n, -1)
    smooth = 1.0
    inter = (xf * yf).sum(1)
    loss = 2.0 * (inter + smooth) / (xf.sum(1) + yf.sum(1) + smooth)
    return loss.sum() / n


if __name__ == "__main__":
    key = jax.random.PRNGKey(0)
    kx, ky = jax.random.split(key)

    # Segmentation-style DiceLoss inputs: logits + binary mask.
    N, C, H, W = 2, 4, 16, 16
    x = jax.random.normal(kx, (N, C, H, W), dtype=jnp.float32)             # logits
    y = (jax.random.uniform(ky, (N, C, H, W)) > 0.5).astype(jnp.float32)   # binary mask

    out = jax.block_until_ready(dice_loss(x, y))
    ref = jax.block_until_ready(_dice_loss_ref(x, y))
    assert jnp.allclose(out, ref, rtol=1e-5, atol=1e-5), (out, ref)

    # Ragged-F path (F=1200 -> minimal lane pad to 1280) + multi-tile
    # accumulation with a masked ragged last row-tile (rows=10, tile_rows=8).
    kx2, ky2 = jax.random.split(ky)
    x2 = jax.random.normal(kx2, (2, 3, 20, 20), dtype=jnp.float32)
    y2 = (jax.random.uniform(ky2, (2, 3, 20, 20)) > 0.5).astype(jnp.float32)
    out2 = jax.block_until_ready(dice_loss(x2, y2, target_tile_bytes=4 * 1024))
    ref2 = jax.block_until_ready(_dice_loss_ref(x2, y2))
    assert jnp.allclose(out2, ref2, rtol=1e-5, atol=1e-5), (out2, ref2)

    # Multi-tile path with the vreg fold active (rows=32, tile_rows=16), bf16.
    kx3, ky3 = jax.random.split(ky2)
    xb = jax.random.normal(kx3, (2, 4, 32, 32), dtype=jnp.bfloat16)
    yb = (jax.random.uniform(ky3, (2, 4, 32, 32)) > 0.5).astype(jnp.bfloat16)
    out3 = jax.block_until_ready(dice_loss(xb, yb, target_tile_bytes=4 * 1024))
    ref3 = jax.block_until_ready(_dice_loss_ref(xb, yb))
    assert jnp.allclose(out3, ref3, rtol=1e-4, atol=1e-4), (out3, ref3)

    print("KERNEL_OK")
</pallas_src>

<mosaic_0001>
module attributes {stable_mosaic.version = 11 : i64} {
  func.func @kernel(%arg0: i32, %arg1: i32, %arg2: memref<1x8x128xf32, #tpu.memory_space<vmem>>, %arg3: memref<1x8x128xf32, #tpu.memory_space<vmem>>, %arg4: memref<1x8x128xf32, #tpu.memory_space<vmem>>, %arg5: memref<1x8x128xf32, #tpu.memory_space<vmem>>) attributes {dimension_semantics = [#tpu.dimension_semantics<parallel>, #tpu.dimension_semantics<arbitrary>], iteration_bounds = array<i64: 2, 1>, scalar_prefetch = 0 : i64, scratch_operands = 0 : i64, tpu.core_type = #tpu.core_type<tc>, window_params = [{transform_indices = @transform_0, window_bounds = array<i64: 1, 8, 128>}, {transform_indices = @transform_1, window_bounds = array<i64: 1, 8, 128>}, {transform_indices = @transform_2, window_bounds = array<i64: 1, 8, 128>}, {transform_indices = @transform_3, window_bounds = array<i64: 1, 8, 128>}]} {
    %c0_i32 = arith.constant 0 : i32
    %0 = arith.cmpi eq, %arg1, %c0_i32 : i32
    %1 = arith.extui %0 : i1 to i32
    %c0_i32_0 = arith.constant 0 : i32
    %2 = arith.cmpi ne, %1, %c0_i32_0 : i32
    scf.if %2 {
      %cst_20 = arith.constant 0.000000e+00 : f32
      %28 = vector.broadcast %cst_20 : f32 to vector<8x128xf32>
      %c0_21 = arith.constant 0 : index
      %c0_22 = arith.constant 0 : index
      %c0_23 = arith.constant 0 : index
      %29 = vector.load %arg4[%c0_21, %c0_22, %c0_23] : memref<1x8x128xf32, #tpu.memory_space<vmem>>, vector<1x8x128xf32>
      %30 = vector.shape_cast %29 : vector<1x8x128xf32> to vector<8x128xf32>
      %31 = vector.shape_cast %28 : vector<8x128xf32> to vector<1x8x128xf32>
      tpu.vector_store %arg4[%c0_21, %c0_22, %c0_23], %31 {strides = array<i32>} : memref<1x8x128xf32, #tpu.memory_space<vmem>>, vector<1x8x128xf32>,
      %cst_24 = arith.constant 0.000000e+00 : f32
      %32 = vector.broadcast %cst_24 : f32 to vector<8x128xf32>
      %c0_25 = arith.constant 0 : index
      %c0_26 = arith.constant 0 : index
      %c0_27 = arith.constant 0 : index
      %33 = vector.load %arg5[%c0_25, %c0_26, %c0_27] : memref<1x8x128xf32, #tpu.memory_space<vmem>>, vector<1x8x128xf32>
      %34 = vector.shape_cast %33 : vector<1x8x128xf32> to vector<8x128xf32>
      %35 = vector.shape_cast %32 : vector<8x128xf32> to vector<1x8x128xf32>
      tpu.vector_store %arg5[%c0_25, %c0_26, %c0_27], %35 {strides = array<i32>} : memref<1x8x128xf32, #tpu.memory_space<vmem>>, vector<1x8x128xf32>,
    } else {
    }
    %c0 = arith.constant 0 : index
    %c0_1 = arith.constant 0 : index
    %c0_2 = arith.constant 0 : index
    %3 = vector.load %arg2[%c0, %c0_1, %c0_2] : memref<1x8x128xf32, #tpu.memory_space<vmem>>, vector<1x8x128xf32>
    %4 = vector.shape_cast %3 : vector<1x8x128xf32> to vector<8x128xf32>
    %cst = arith.constant 5.000000e-01 : f32
    %5 = vector.broadcast %cst : f32 to vector<8x128xf32>
    %6 = arith.mulf %5, %4 : vector<8x128xf32>
    %7 = math.tanh %6 : vector<8x128xf32>
    %cst_3 = arith.constant 5.000000e-01 : f32
    %8 = vector.broadcast %cst_3 : f32 to vector<8x128xf32>
    %9 = arith.mulf %8, %7 : vector<8x128xf32>
    %cst_4 = arith.constant 5.000000e-01 : f32
    %10 = vector.broadcast %cst_4 : f32 to vector<8x128xf32>
    %11 = arith.addf %9, %10 : vector<8x128xf32>
    %c0_5 = arith.constant 0 : index
    %c0_6 = arith.constant 0 : index
    %c0_7 = arith.constant 0 : index
    %12 = vector.load %arg3[%c0_5, %c0_6, %c0_7] : memref<1x8x128xf32, #tpu.memory_space<vmem>>, vector<1x8x128xf32>
    %13 = vector.shape_cast %12 : vector<1x8x128xf32> to vector<8x128xf32>
    %14 = arith.mulf %11, %13 : vector<8x128xf32>
    %15 = arith.addf %11, %13 : vector<8x128xf32>
    %c0_8 = arith.constant 0 : index
    %c0_9 = arith.constant 0 : index
    %c0_10 = arith.constant 0 : index
    %16 = vector.load %arg4[%c0_8, %c0_9, %c0_10] : memref<1x8x128xf32, #tpu.memory_space<vmem>>, vector<1x8x128xf32>
    %17 = vector.shape_cast %16 : vector<1x8x128xf32> to vector<8x128xf32>
    %18 = arith.addf %17, %14 : vector<8x128xf32>
    %c0_11 = arith.constant 0 : index
    %c0_12 = arith.constant 0 : index
    %c0_13 = arith.constant 0 : index
    %19 = vector.load %arg4[%c0_11, %c0_12, %c0_13] : memref<1x8x128xf32, #tpu.memory_space<vmem>>, vector<1x8x128xf32>
    %20 = vector.shape_cast %19 : vector<1x8x128xf32> to vector<8x128xf32>
    %21 = vector.shape_cast %18 : vector<8x128xf32> to vector<1x8x128xf32>
    tpu.vector_store %arg4[%c0_11, %c0_12, %c0_13], %21 {strides = array<i32>} : memref<1x8x128xf32, #tpu.memory_space<vmem>>, vector<1x8x128xf32>,
    %c0_14 = arith.constant 0 : index
    %c0_15 = arith.constant 0 : index
    %c0_16 = arith.constant 0 : index
    %22 = vector.load %arg5[%c0_14, %c0_15, %c0_16] : memref<1x8x128xf32, #tpu.memory_space<vmem>>, vector<1x8x128xf32>
    %23 = vector.shape_cast %22 : vector<1x8x128xf32> to vector<8x128xf32>
    %24 = arith.addf %23, %15 : vector<8x128xf32>
    %c0_17 = arith.constant 0 : index
    %c0_18 = arith.constant 0 : index
    %c0_19 = arith.constant 0 : index
    %25 = vector.load %arg5[%c0_17, %c0_18, %c0_19] : memref<1x8x128xf32, #tpu.memory_space<vmem>>, vector<1x8x128xf32>
    %26 = vector.shape_cast %25 : vector<1x8x128xf32> to vector<8x128xf32>
    %27 = vector.shape_cast %24 : vector<8x128xf32> to vector<1x8x128xf32>
    tpu.vector_store %arg5[%c0_17, %c0_18, %c0_19], %27 {strides = array<i32>} : memref<1x8x128xf32, #tpu.memory_space<vmem>>, vector<1x8x128xf32>,
    return
  }
  func.func @transform_0(%arg0: i32, %arg1: i32) -> (i32, i32, i32) {
    %c0_i32 = arith.constant 0 : i32
    %c0_i32_0 = arith.constant 0 : i32
    return %arg0, %arg1, %c0_i32 : i32, i32, i32
  }
  func.func @transform_1(%arg0: i32, %arg1: i32) -> (i32, i32, i32) {
    %c0_i32 = arith.constant 0 : i32
    %c0_i32_0 = arith.constant 0 : i32
    return %arg0, %arg1, %c0_i32 : i32, i32, i32
  }
  func.func @transform_2(%arg0: i32, %arg1: i32) -> (i32, i32, i32) {
    %c0_i32 = arith.constant 0 : i32
    %c0_i32_0 = arith.constant 0 : i32
    %c0_i32_1 = arith.constant 0 : i32
    return %arg0, %c0_i32, %c0_i32_0 : i32, i32, i32
  }
  func.func @transform_3(%arg0: i32, %arg1: i32) -> (i32, i32, i32) {
    %c0_i32 = arith.constant 0 : i32
    %c0_i32_0 = arith.constant 0 : i32
    %c0_i32_1 = arith.constant 0 : i32
    return %arg0, %c0_i32, %c0_i32_0 : i32, i32, i32
  }
}

</mosaic_0001>

<bundles_post_ra>
// kernel: tpu_custom_call.1
= control target key start
LH: loop header
LB: loop body
LE: loop exit
PB: predicated region body
PF: predicated region fallthrough
CT: control target
= control target key end

     0   :  { %9 = vsyncpa [#allocation3], 0  ;;  %s930_s0 = inlined_call_operand.hbm [shape: f32[2,8,128], index: 0, kind: input, shape index: {}]   ;;  %s931_s1 = inlined_call_operand.hbm [shape: f32[2,8,128], index: 1, kind: input, shape index: {}]   ;;  %s932_s2 = inlined_call_operand.hbm [shape: f32[2,8,128], index: 2, kind: output, shape index: {0}]   ;;  %s933_s3 = inlined_call_operand.hbm [shape: f32[2,8,128], index: 3, kind: output, shape index: {1}]  }
   0x1   :  { %11 = vsyncpa [#allocation3 + $0x1], 0 }
   0x2   :  { %12 = vsyncpa [#allocation6], 0 }
   0x3   :  { %14 = vsyncpa [#allocation6 + $0x1], 0 }
   0x4   :  { %15 = vsyncpa [#allocation4], 0 }
   0x5   :  { %17 = vsyncpa [#allocation4 + $0x1], 0 }
   0x6   :  { %18 = vsyncpa [#allocation9], 0 }
   0x7   :  { %20 = vsyncpa [#allocation9 + $0x1], 0  ;;  %s729_s12 = smov 0   ;;  %s731_s13 = smov 0  }
   0x8   :  { %s733_s14 = smov 0   ;;  %s735_s15 = smov 0  }
   0x9   :  { %s737_s16 = smov 0   ;;  %s739_s17 = smov 0  }
   0xa LB: > { %s439_s18 = sadd.s32 4294967295, %s703_s17   ;;  %s440_s19 = sadd.s32 4294967294, %s703_s17   ;;  %s703_s17 = sphi %s739_s17, %s26_s17   ;;  %s699_s16 = sphi %s737_s16, %s945_s16   ;;  %s695_s15 = sphi %s735_s15, %s944_s15   ;;  %s691_s14 = sphi %s733_s14, %s943_s14   ;;  %s687_s13 = sphi %s731_s13, %s942_s13   ;;  %s683_s12 = sphi %s729_s12, %s941_s12  }
   0xb   : > { %s38_s20 = sadd.s32 1, %s699_s16  ;;  %s47_s21 = sadd.s32 1, %s691_s14 }
   0xc   : > { %p40_p0 = scmp.ge.s32.totalorder %s38_s20, 2  ;;  %p54_p1 = scmp.ne.s32.totalorder %s691_s14, %s687_s13 }
   0xd   : > { %p55_p2 = scmp.eq.s32.totalorder %s703_s17, 0  ;;  %p60_p3 = scmp.ne.s32.totalorder %s687_s13, %s683_s12 }
   0xe   : > { %s947_s20 = smov (%p40_p0, %s38_s20), 0  ;;  %p61_p5 = scmp.eq.s32.totalorder %s439_s18, 0 }
   0xf   : > { %p770_p4 = por %p55_p2, %p54_p1  ;;  %s42_s23 = ssub.s32 %s699_s16, %s947_s20 }
  0x10   : > { %p112_p6 = scmp.eq.s32.totalorder %s439_s18, 1  ;;  %p45_p7 = scmp.eq.s32.totalorder %s42_s23, 0 }
  0x11   : > { %p776_p8 = por %p61_p5, %p60_p3  ;;  %p118_p10 = scmp.eq.s32.totalorder %s440_s19, 1 }
  0x12   : > { %p780_p9 = por %p112_p6, %p54_p1  ;;  %p480_p13 = scmp.lt.s32.totalorder %s703_s17, 2 }
  0x13   : > { %s785_s26 = scalar_select %p45_p7, %s691_s14, %s47_s21  }
  0x14   : > { %p787_p11 = por %p118_p10, %p60_p3  ;;  %s794_s28 = sand.u32 1, %s691_s14  }
  0x15   : > { %s443_s29 = sshll.u32 %s794_s28, 3  ;;  %s444_s30 = sshll.u32 %s699_s16, 7 }
  0x16   : > { %s174_s6 = scalar_lea.hbm %s930_s0, %s444_s30  ;;  %s168_s7 = scalar_lea.vmem [#allocation2], %s443_s29 }
  0x17   : > { %s176_s8 = sshll.u32 %s168_s7, 4  ;;  %p803_p0 = pnand %p480_p13, %p770_p4  ;;  %s177_s8 = int_to_ptr.vmem [resolvable:$true] %s176_s8 }
  0x18   : > { %p447_p1 = scmp.ge.s32.totalorder %s703_s17, 1  ;;  %p200_p2 = scmp.lt.s32.totalorder %s703_s17, 3 }
  0x19   : > { %s165_s10 = scalar_lea.sflag [#allocation3], %s794_s28  ;;  %p535_p3 = pneg %p803_p0 }
  0x1a   : > { %s546_s11 = scalar_lea.vmem %s177_s8, 128  ;;  %s705_s18 = smov [#allocation2]  }
  0x1b   : > { %p547_p5 = scmp.ne.s32.totalorder %s177_s8, %s546_s11  ;;  %s551_s19 = sshll.u32 %s705_s18, 4  ;;  %s552_s19 = int_to_ptr.vmem [resolvable:$false] %s551_s19 }
  0x1c   : > { %s553_s21 = scalar_lea.vmem %s552_s19, 256  ;;  %p554_p4 = scmp.lt.s32.totalorder %s177_s8, %s552_s19 }
  0x1d   : > { %p549_p6 = pnand %p547_p5, %p535_p3  ;;  %p555_p10 = scmp.lt.s32.totalorder %s553_s21, %s546_s11 }
  0x1f   : > { %p550_p7 = pneg %p549_p6  ;;  %p556_p13 = por %p555_p10, %p554_p4 }
  0x21   : > { %p557_p12 = pnand %p556_p13, %p550_p7 }
  0x23   : > { %560 = shalt.err (!%p557_p12)
}
  0x24   : > { %469 = dma.hbm_to_vmem [thread:$0]  (!%p803_p0), %s174_s6, 128, %s177_s8, %s165_s10  }
  0x25   : > { %p821_p5 = pnand %p447_p1, %p200_p2  ;;  %s193_s5 = scalar_lea.hbm %s931_s1, %s444_s30 }
  0x26   : > { %s187_s7 = scalar_lea.vmem [#allocation5], %s443_s29  ;;  %s184_s18 = scalar_lea.sflag [#allocation6], %s794_s28 }
  0x27   : > { %s195_s11 = sshll.u32 %s187_s7, 4  ;;  %s706_s6 = smov [#allocation5]   ;;  %s196_s11 = int_to_ptr.vmem [resolvable:$true] %s195_s11 }
  0x28   : > { %s574_s19 = scalar_lea.vmem %s196_s11, 128  ;;  %s579_s8 = sshll.u32 %s706_s6, 4  ;;  %s580_s8 = int_to_ptr.vmem [resolvable:$false] %s579_s8 }
  0x29   : > { %p575_p12 = scmp.ne.s32.totalorder %s196_s11, %s574_s19  ;;  %s581_s10 = scalar_lea.vmem %s580_s8, 256 }
  0x2a   : > { %p582_p1 = scmp.lt.s32.totalorder %s196_s11, %s580_s8  ;;  %p583_p2 = scmp.lt.s32.totalorder %s581_s10, %s574_s19 }
  0x2b   : > { %p577_p6 = pnand %p575_p12, %p535_p3 }
  0x2c   : > { %p584_p4 = por %p583_p2, %p582_p1 }
  0x2d   : > { %p578_p7 = pneg %p577_p6 }
  0x2f   : > { %p585_p10 = pnand %p584_p4, %p578_p7 }
  0x31   : > { %588 = shalt.err (!%p585_p10)
}
  0x32   : > { %472 = dma.hbm_to_vmem [thread:$0]  (!%p803_p0), %s193_s5, 128, %s196_s11, %s184_s18  }
  0x33   : > { %204 = sbr.rel (%p821_p5) target bundleno = 117 (0x75), region = 28  ;;  %s837_s28 = sand.u32 (!%p821_p5), 1, %s687_s13  }
  0x34   : > { %s448_s29 = sshll.u32 (!%p821_p5), %s837_s28, 3  ;;  %s207_s30 = scalar_lea.sflag (!%p821_p5), [#allocation3], %s837_s28 }
  0x35   : > { %s210_s21 = scalar_lea.vmem (!%p821_p5), [#allocation2], %s448_s29 }
  0x38   : > { %666 = dma.done.wait (%p776_p8), %s207_s30, 128  }
  0x39   : > { %668 = vsyncadd (%p776_p8), %s207_s30, 4294967168  ;;  %s216_s9 = scalar_lea.sflag [#allocation6], %s837_s28  ;;  %s219_s23 = scalar_lea.vmem [#allocation5], %s448_s29 }
  0x3a   : > { %670 = dma.done.wait (%p776_p8), %s216_s9, 128  }
  0x3b   : > { %672 = vsyncadd (%p776_p8), %s216_s9, 4294967168  ;;  %v258_v0 = vld [vmem:[%s210_s21] sm:$0xff]  ;;  %v263_v4 = vld [vmem:[%s219_s23] sm:$0xff]  ;;  %s454_s22 = sshll.u32 %s695_s15, 7  ;;  %s244_s4 = scalar_lea.vmem [#allocation7], %s448_s29 }
  0x3c   : > { %v259_v1 = vmul.f32 0.5, %v258_v0  ;;  %s291_s5 = sshll.u32 %s244_s4, 4  ;;  %s251_s7 = scalar_lea.vmem [#allocation8], %s448_s29  ;;  %s856_s5 = int_to_ptr.vmem [resolvable:$true] %s291_s5 }
  0x3d   : > { %s304_s11 = sshll.u32 %s251_s7, 4  ;;  %s854_s19 = scalar_lea.hbm %s932_s2, %s454_s22  ;;  %s863_s11 = int_to_ptr.vmem [resolvable:$true] %s304_s11 }
  0x3e   : > { %531 = vtanh.f32 %v259_v1  ;;  %s861_s15 = scalar_lea.hbm %s933_s3, %s454_s22  ;;  %s273_s10 = scalar_lea.sflag [#allocation4], %s837_s28 }
  0x3f   : > { %s589_s29 = scalar_lea.vmem %s856_s5, 128  ;;  %s707_s30 = smov [#allocation7]  }
  0x40   : > { %p590_p8 = scmp.ne.s32.totalorder %s856_s5, %s589_s29  ;;  %s593_s21 = sshll.u32 %s707_s30, 4  ;;  %s594_s21 = int_to_ptr.vmem [resolvable:$false] %s593_s21 }
  0x41   : > { %s595_s9 = scalar_lea.vmem %s594_s21, 256  ;;  %p596_p13 = scmp.lt.s32.totalorder %s856_s5, %s594_s21 }
  0x42   : > { %p591_p0 = pnand %p590_p8, %p780_p9  ;;  %p597_p5 = scmp.lt.s32.totalorder %s595_s9, %s589_s29 }
  0x44   : > { %p592_p3 = pneg %p591_p0  ;;  %p598_p12 = por %p597_p5, %p596_p13 }
  0x46   : > { %p599_p6 = pnand %p598_p12, %p592_p3 }
  0x4b   : > { %v532_v2 = vpop.eup %531 }
  0x4c   : > { %v261_v3 = vmul.f32 0.5, %v532_v2 }
  0x4e   : > { %v262_v5 = vadd.f32 0.5, %v261_v3 }
  0x50   : > { %v264_v6 = vmul.f32 %v263_v4, %v262_v5  ;;  %v265_v7 = vadd.f32 %v263_v4, %v262_v5 }
  0x52   : > { %268 = vst [vmem:[%s244_s4] sm:$0xff] %v264_v6  ;;  %271 = vst [vmem:[%s251_s7] sm:$0xff] %v265_v7 }
  0x53   : > { %602 = shalt.err (!%p599_p6)
}
  0x54   : > { %s603_s23 = scalar_lea.hbm %s854_s19, 128  ;;  %s607_s7 = scalar_lea.hbm %s932_s2, 256 }
  0x55   : > { %p604_p7 = scmp.ne.s32.totalorder %s854_s19, %s603_s23  ;;  %p608_p4 = scmp.lt.s32.totalorder %s854_s19, %s932_s2 }
  0x56   : > { %p609_p10 = scmp.lt.s32.totalorder %s607_s7, %s603_s23 }
  0x57   : > { %p605_p1 = pnand %p604_p7, %p780_p9 }
  0x58   : > { %p610_p8 = por %p609_p10, %p608_p4 }
  0x59   : > { %p606_p2 = pneg %p605_p1 }
  0x5b   : > { %p611_p0 = pnand %p610_p8, %p606_p2 }
  0x5d   : > { %614 = shalt.err (!%p611_p0)
}
  0x5e   : > { %462 = dma.vmem_to_hbm [thread:$0]  (%p780_p9), %s856_s5, 128, %s854_s19, %s273_s10  }
  0x5f   : > { %s278_s6 = scalar_lea.sflag [#allocation9], %s837_s28  ;;  %s615_s8 = scalar_lea.vmem %s863_s11, 128 }
  0x60   : > { %p616_p3 = scmp.ne.s32.totalorder %s863_s11, %s615_s8  ;;  %s708_s29 = smov [#allocation8]  }
  0x61   : > { %s619_s30 = sshll.u32 %s708_s29, 4  ;;  %s620_s30 = int_to_ptr.vmem [resolvable:$false] %s619_s30 }
  0x62   : > { %p617_p13 = pnand %p616_p3, %p780_p9  ;;  %s621_s21 = scalar_lea.vmem %s620_s30, 256 }
  0x63   : > { %p622_p12 = scmp.lt.s32.totalorder %s863_s11, %s620_s30  ;;  %p623_p6 = scmp.lt.s32.totalorder %s621_s21, %s615_s8 }
  0x64   : > { %p618_p5 = pneg %p617_p13 }
  0x65   : > { %p624_p7 = por %p623_p6, %p622_p12 }
  0x67   : > { %p625_p1 = pnand %p624_p7, %p618_p5 }
  0x69   : > { %628 = shalt.err (!%p625_p1)
}
  0x6a   : > { %s629_s5 = scalar_lea.hbm %s861_s15, 128  ;;  %s633_s10 = scalar_lea.hbm %s933_s3, 256 }
  0x6b   : > { %p630_p2 = scmp.ne.s32.totalorder %s861_s15, %s629_s5  ;;  %p634_p8 = scmp.lt.s32.totalorder %s861_s15, %s933_s3 }
  0x6c   : > { %p635_p0 = scmp.lt.s32.totalorder %s633_s10, %s629_s5 }
  0x6d   : > { %p631_p4 = pnand %p630_p2, %p780_p9 }
  0x6e   : > { %p636_p3 = por %p635_p0, %p634_p8 }
  0x6f   : > { %p632_p10 = pneg %p631_p4 }
  0x71   : > { %p637_p13 = pnand %p636_p3, %p632_p10 }
  0x73   : > { %640 = shalt.err (!%p637_p13)
}
  0x74   : > { %463 = dma.vmem_to_hbm [thread:$0]  (%p780_p9), %s863_s11, 128, %s861_s15, %s278_s6  }
  0x75 PF: > { %s316_s22 = sand.u32 1, %s683_s12   ;;  %p940_p5 = scmp.ge.s32.totalorder %s703_s17, 2 }
  0x76   : > { %s317_s4 = scalar_lea.sflag [#allocation4], %s316_s22 }
  0x77   : > { %p474_p12 = pnand %p940_p5, %p787_p11 }
  0x79   : > { %p475_p6 = pneg %p474_p12 }
  0x7b   : > { %674 = dma.done.wait (%p475_p6), %s317_s4, 128  }
  0x7c   : > { %676 = vsyncadd (%p475_p6), %s317_s4, 4294967168  ;;  %s326_s7 = scalar_lea.sflag [#allocation9], %s316_s22 }
  0x7d   : > { %678 = dma.done.wait (%p475_p6), %s326_s7, 128  }
  0x7e   : > { %680 = vsyncadd (%p475_p6), %s326_s7, 4294967168  ;;  %s26_s17 = sadd.s32 1, %s703_s17   ;;  %s941_s12 = smov %s687_s13 }
  0x7f   : > { %p23_p7 = scmp.ge.s32.totalorder %s26_s17, 4   ;;  %s942_s13 = smov %s691_s14 }
  0x80   : > { %s943_s14 = smov %s785_s26  ;;  %s944_s15 = smov %s699_s16 }
  0x81   : > { %s945_s16 = smov %s947_s20  ;;  %25 = sbr.rel (!%p23_p7) target bundleno = 10 (0xa), region = 107 }
  0x86   :  { %331 = vsyncpa [#allocation3], 1 }
  0x87   :  { %333 = vsyncpa [#allocation3 + $0x1], 1 }
  0x88   :  { %334 = vsyncpa [#allocation6], 1 }
  0x89   :  { %336 = vsyncpa [#allocation6 + $0x1], 1 }
  0x8a   :  { %337 = vsyncpa [#allocation4], 1 }
  0x8b   :  { %339 = vsyncpa [#allocation4 + $0x1], 1 }
  0x8c   :  { %340 = vsyncpa [#allocation9], 1 }
  0x8d   :  { %342 = vsyncpa [#allocation9 + $0x1], 1 }

</bundles_post_ra>
